<compile_context>
chip_gen: v6e
topology: v6e:2x2x1
jax: 0.10.0
libtpu: 0.0.40
codegen_flags: <defaults>
</compile_context>

<pallas_src>
import jax
import jax.numpy as jnp
from jax.experimental import pallas as pl
from jax.experimental.pallas import tpu as pltpu

LANE = 128


def _round_up(x: int, m: int) -> int:
    return ((x + m - 1) // m) * m


def qnet_kernel(x_ref,
                w1_ref, b1_ref,
                w2_ref, b2_ref,
                w3_ref, b3_ref,
                w4_ref, b4_ref,
                o_ref):
    """Fused 4-layer MLP forward on one batch tile. Weights stay VMEM-resident."""
    x = x_ref[...]  # bf16 [tile_b, state_dim]

    # Layer 1: Linear(state_dim -> 256) + ReLU   (Dropout = identity in eval)
    h = jnp.dot(x, w1_ref[...], preferred_element_type=jnp.float32) + b1_ref[...]
    h = jnp.maximum(h, 0.0).astype(jnp.bfloat16)

    # Layer 2: Linear(256 -> 128) + ReLU          (Dropout = identity in eval)
    h = jnp.dot(h, w2_ref[...], preferred_element_type=jnp.float32) + b2_ref[...]
    h = jnp.maximum(h, 0.0).astype(jnp.bfloat16)

    # Layer 3: Linear(128 -> 64) + ReLU
    h = jnp.dot(h, w3_ref[...], preferred_element_type=jnp.float32) + b3_ref[...]
    h = jnp.maximum(h, 0.0).astype(jnp.bfloat16)

    # Layer 4: Linear(64 -> num_actions), output columns padded to 128 lanes.
    out = jnp.dot(h, w4_ref[...], preferred_element_type=jnp.float32) + b4_ref[...]
    o_ref[...] = out.astype(o_ref.dtype)


def qnet_forward(x, params, *, tile_b: int = 256):
    """x: [B, state_dim] float32.  params: dict of (W [in,out], b [1,out])."""
    B, state_dim = x.shape
    num_actions = params["w4"].shape[1]
    n_pad = _round_up(num_actions, LANE)  # lane-dense output columns

    # bf16 weights / activations (f32 accumulation inside the kernel).
    xb = x.astype(jnp.bfloat16)
    w1 = params["w1"].astype(jnp.bfloat16)
    w2 = params["w2"].astype(jnp.bfloat16)
    w3 = params["w3"].astype(jnp.bfloat16)
    w4 = jnp.pad(params["w4"].astype(jnp.bfloat16),
                 ((0, 0), (0, n_pad - num_actions)))
    b1, b2, b3 = params["b1"], params["b2"], params["b3"]  # f32 [1, out]
    b4 = jnp.pad(params["b4"], ((0, 0), (0, n_pad - num_actions)))

    # Batch tiling: sublane-aligned (16 rows for bf16); pad batch to whole tiles.
    tile_b = min(tile_b, _round_up(B, 16))
    b_pad = _round_up(B, tile_b)
    if b_pad != B:
        xb = jnp.pad(xb, ((0, b_pad - B), (0, 0)))
    grid = (b_pad // tile_b,)

    weights = (w1, b1, w2, b2, w3, b3, w4, b4)

    # x / out tiles stream over the batch grid; weights & biases are resident
    # (index_map always returns block (0, 0)).
    in_specs = [pl.BlockSpec((tile_b, state_dim), lambda i: (i, 0))]
    in_specs += [pl.BlockSpec(w.shape, lambda i: (0, 0)) for w in weights]
    out_spec = pl.BlockSpec((tile_b, n_pad), lambda i: (i, 0))

    out = pl.pallas_call(
        qnet_kernel,
        out_shape=jax.ShapeDtypeStruct((b_pad, n_pad), jnp.float32),
        grid=grid,
        in_specs=in_specs,
        out_specs=out_spec,
        compiler_params=pltpu.CompilerParams(
            dimension_semantics=("parallel",),  # shards batch tiles over v7x's 2 TCs
        ),
    )(xb, *weights)

    return out[:B, :num_actions]


def init_qnet_params(key, state_dim, num_actions):
    """Deterministic PyTorch-style init: U(-1/sqrt(fan_in), 1/sqrt(fan_in))."""
    dims = [state_dim, 256, 128, 64, num_actions]
    params = {}
    for i in range(4):
        fan_in, fan_out = dims[i], dims[i + 1]
        key, kw, kb = jax.random.split(key, 3)
        bound = 1.0 / (fan_in ** 0.5)
        # Stored as [in, out] (transposed w.r.t. torch's [out, in]).
        params[f"w{i + 1}"] = jax.random.uniform(
            kw, (fan_in, fan_out), jnp.float32, minval=-bound, maxval=bound)
        params[f"b{i + 1}"] = jax.random.uniform(
            kb, (1, fan_out), jnp.float32, minval=-bound, maxval=bound)
    return params


def qnet_reference(x, params):
    """Plain-JAX f32 reference of the same forward (dropout in eval = identity)."""
    h = jnp.maximum(x @ params["w1"] + params["b1"], 0.0)
    h = jnp.maximum(h @ params["w2"] + params["b2"], 0.0)
    h = jnp.maximum(h @ params["w3"] + params["b3"], 0.0)
    return h @ params["w4"] + params["b4"]


if __name__ == "__main__":
    key = jax.random.PRNGKey(0)
    B, state_dim, num_actions = 8, 32, 8

    key, kx, kp = jax.random.split(key, 3)
    x = jax.random.normal(kx, (B, state_dim), jnp.float32)
    params = init_qnet_params(kp, state_dim, num_actions)

    out = qnet_forward(x, params)
    out = jax.block_until_ready(out)

    ref = qnet_reference(x, params)
    assert out.shape == (B, num_actions), out.shape
    # bf16 weights/activations with f32 accumulation -> loose tolerance vs f32 ref.
    assert jnp.allclose(out, ref, atol=5e-2, rtol=5e-2), "mismatch vs reference"

    print("KERNEL_OK")
</pallas_src>

<mosaic_0001>
module attributes {stable_mosaic.version = 11 : i64} {
  func.func @qnet_kernel(%arg0: i32, %arg1: memref<16x32xbf16, #tpu.memory_space<vmem>>, %arg2: memref<32x256xbf16, #tpu.memory_space<vmem>>, %arg3: memref<1x256xf32, #tpu.memory_space<vmem>>, %arg4: memref<256x128xbf16, #tpu.memory_space<vmem>>, %arg5: memref<1x128xf32, #tpu.memory_space<vmem>>, %arg6: memref<128x64xbf16, #tpu.memory_space<vmem>>, %arg7: memref<1x64xf32, #tpu.memory_space<vmem>>, %arg8: memref<64x128xbf16, #tpu.memory_space<vmem>>, %arg9: memref<1x128xf32, #tpu.memory_space<vmem>>, %arg10: memref<16x128xf32, #tpu.memory_space<vmem>>) attributes {dimension_semantics = [#tpu.dimension_semantics<parallel>], iteration_bounds = array<i64: 1>, scalar_prefetch = 0 : i64, scratch_operands = 0 : i64, tpu.core_type = #tpu.core_type<tc>, window_params = [{transform_indices = @transform_0, window_bounds = array<i64: 16, 32>}, {pipeline_mode = #tpu.pipeline_mode<synchronous>, transform_indices = @transform_1, window_bounds = array<i64: 32, 256>}, {pipeline_mode = #tpu.pipeline_mode<synchronous>, transform_indices = @transform_2, window_bounds = array<i64: 1, 256>}, {pipeline_mode = #tpu.pipeline_mode<synchronous>, transform_indices = @transform_3, window_bounds = array<i64: 256, 128>}, {pipeline_mode = #tpu.pipeline_mode<synchronous>, transform_indices = @transform_4, window_bounds = array<i64: 1, 128>}, {pipeline_mode = #tpu.pipeline_mode<synchronous>, transform_indices = @transform_5, window_bounds = array<i64: 128, 64>}, {pipeline_mode = #tpu.pipeline_mode<synchronous>, transform_indices = @transform_6, window_bounds = array<i64: 1, 64>}, {pipeline_mode = #tpu.pipeline_mode<synchronous>, transform_indices = @transform_7, window_bounds = array<i64: 64, 128>}, {pipeline_mode = #tpu.pipeline_mode<synchronous>, transform_indices = @transform_8, window_bounds = array<i64: 1, 128>}, {transform_indices = @transform_9, window_bounds = array<i64: 16, 128>}]} {
    %c0 = arith.constant 0 : index
    %c0_0 = arith.constant 0 : index
    %0 = vector.load %arg1[%c0, %c0_0] : memref<16x32xbf16, #tpu.memory_space<vmem>>, vector<16x32xbf16>
    %c0_1 = arith.constant 0 : index
    %c0_2 = arith.constant 0 : index
    %1 = vector.load %arg2[%c0_1, %c0_2] : memref<32x256xbf16, #tpu.memory_space<vmem>>, vector<32x256xbf16>
    %cst = arith.constant dense<0.000000e+00> : vector<16x256xf32>
    %2 = tpu.matmul %0, %1, %cst {dimension_numbers = #tpu.dot_dimension_numbers<[1], [0], [0], [1], [0, 0, 1, 1], [], []>} : vector<16x32xbf16>, vector<32x256xbf16>, vector<16x256xf32> -> vector<16x256xf32>
    %c0_3 = arith.constant 0 : index
    %c0_4 = arith.constant 0 : index
    %3 = vector.load %arg3[%c0_3, %c0_4] : memref<1x256xf32, #tpu.memory_space<vmem>>, vector<1x256xf32>
    %4 = vector.broadcast %3 : vector<1x256xf32> to vector<16x256xf32>
    %5 = arith.addf %2, %4 : vector<16x256xf32>
    %cst_5 = arith.constant 0.000000e+00 : f32
    %6 = vector.broadcast %cst_5 : f32 to vector<16x256xf32>
    %7 = arith.maximumf %5, %6 : vector<16x256xf32>
    %8 = arith.truncf %7 : vector<16x256xf32> to vector<16x256xbf16>
    %c0_6 = arith.constant 0 : index
    %c0_7 = arith.constant 0 : index
    %9 = vector.load %arg4[%c0_6, %c0_7] : memref<256x128xbf16, #tpu.memory_space<vmem>>, vector<256x128xbf16>
    %cst_8 = arith.constant dense<0.000000e+00> : vector<16x128xf32>
    %10 = tpu.matmul %8, %9, %cst_8 {dimension_numbers = #tpu.dot_dimension_numbers<[1], [0], [0], [1], [0, 0, 1, 1], [], []>} : vector<16x256xbf16>, vector<256x128xbf16>, vector<16x128xf32> -> vector<16x128xf32>
    %c0_9 = arith.constant 0 : index
    %c0_10 = arith.constant 0 : index
    %11 = vector.load %arg5[%c0_9, %c0_10] : memref<1x128xf32, #tpu.memory_space<vmem>>, vector<1x128xf32>
    %12 = vector.broadcast %11 : vector<1x128xf32> to vector<16x128xf32>
    %13 = arith.addf %10, %12 : vector<16x128xf32>
    %cst_11 = arith.constant 0.000000e+00 : f32
    %14 = vector.broadcast %cst_11 : f32 to vector<16x128xf32>
    %15 = arith.maximumf %13, %14 : vector<16x128xf32>
    %16 = arith.truncf %15 : vector<16x128xf32> to vector<16x128xbf16>
    %c0_12 = arith.constant 0 : index
    %c0_13 = arith.constant 0 : index
    %17 = vector.load %arg6[%c0_12, %c0_13] : memref<128x64xbf16, #tpu.memory_space<vmem>>, vector<128x64xbf16>
    %cst_14 = arith.constant dense<0.000000e+00> : vector<16x64xf32>
    %18 = tpu.matmul %16, %17, %cst_14 {dimension_numbers = #tpu.dot_dimension_numbers<[1], [0], [0], [1], [0, 0, 1, 1], [], []>} : vector<16x128xbf16>, vector<128x64xbf16>, vector<16x64xf32> -> vector<16x64xf32>
    %c0_15 = arith.constant 0 : index
    %c0_16 = arith.constant 0 : index
    %19 = vector.load %arg7[%c0_15, %c0_16] : memref<1x64xf32, #tpu.memory_space<vmem>>, vector<1x64xf32>
    %20 = vector.broadcast %19 : vector<1x64xf32> to vector<16x64xf32>
    %21 = arith.addf %18, %20 : vector<16x64xf32>
    %cst_17 = arith.constant 0.000000e+00 : f32
    %22 = vector.broadcast %cst_17 : f32 to vector<16x64xf32>
    %23 = arith.maximumf %21, %22 : vector<16x64xf32>
    %24 = arith.truncf %23 : vector<16x64xf32> to vector<16x64xbf16>
    %c0_18 = arith.constant 0 : index
    %c0_19 = arith.constant 0 : index
    %25 = vector.load %arg8[%c0_18, %c0_19] : memref<64x128xbf16, #tpu.memory_space<vmem>>, vector<64x128xbf16>
    %cst_20 = arith.constant dense<0.000000e+00> : vector<16x128xf32>
    %26 = tpu.matmul %24, %25, %cst_20 {dimension_numbers = #tpu.dot_dimension_numbers<[1], [0], [0], [1], [0, 0, 1, 1], [], []>} : vector<16x64xbf16>, vector<64x128xbf16>, vector<16x128xf32> -> vector<16x128xf32>
    %c0_21 = arith.constant 0 : index
    %c0_22 = arith.constant 0 : index
    %27 = vector.load %arg9[%c0_21, %c0_22] : memref<1x128xf32, #tpu.memory_space<vmem>>, vector<1x128xf32>
    %28 = vector.broadcast %27 : vector<1x128xf32> to vector<16x128xf32>
    %29 = arith.addf %26, %28 : vector<16x128xf32>
    %c0_23 = arith.constant 0 : index
    %c0_24 = arith.constant 0 : index
    %30 = vector.load %arg10[%c0_23, %c0_24] : memref<16x128xf32, #tpu.memory_space<vmem>>, vector<16x128xf32>
    tpu.vector_store %arg10[%c0_23, %c0_24], %29 {strides = array<i32>} : memref<16x128xf32, #tpu.memory_space<vmem>>, vector<16x128xf32>,
    return
  }
  func.func @transform_0(%arg0: i32) -> (i32, i32) {
    %c0_i32 = arith.constant 0 : i32
    %c0_i32_0 = arith.constant 0 : i32
    return %arg0, %c0_i32 : i32, i32
  }
  func.func @transform_1(%arg0: i32) -> (i32, i32) {
    %c0_i32 = arith.constant 0 : i32
    %c0_i32_0 = arith.constant 0 : i32
    %c0_i32_1 = arith.constant 0 : i32
    return %c0_i32, %c0_i32_0 : i32, i32
  }
  func.func @transform_2(%arg0: i32) -> (i32, i32) {
    %c0_i32 = arith.constant 0 : i32
    %c0_i32_0 = arith.constant 0 : i32
    %c0_i32_1 = arith.constant 0 : i32
    return %c0_i32, %c0_i32_0 : i32, i32
  }
  func.func @transform_3(%arg0: i32) -> (i32, i32) {
    %c0_i32 = arith.constant 0 : i32
    %c0_i32_0 = arith.constant 0 : i32
    %c0_i32_1 = arith.constant 0 : i32
    return %c0_i32, %c0_i32_0 : i32, i32
  }
  func.func @transform_4(%arg0: i32) -> (i32, i32) {
    %c0_i32 = arith.constant 0 : i32
    %c0_i32_0 = arith.constant 0 : i32
    %c0_i32_1 = arith.constant 0 : i32
    return %c0_i32, %c0_i32_0 : i32, i32
  }
  func.func @transform_5(%arg0: i32) -> (i32, i32) {
    %c0_i32 = arith.constant 0 : i32
    %c0_i32_0 = arith.constant 0 : i32
    %c0_i32_1 = arith.constant 0 : i32
    return %c0_i32, %c0_i32_0 : i32, i32
  }
  func.func @transform_6(%arg0: i32) -> (i32, i32) {
    %c0_i32 = arith.constant 0 : i32
    %c0_i32_0 = arith.constant 0 : i32
    %c0_i32_1 = arith.constant 0 : i32
    return %c0_i32, %c0_i32_0 : i32, i32
  }
  func.func @transform_7(%arg0: i32) -> (i32, i32) {
    %c0_i32 = arith.constant 0 : i32
    %c0_i32_0 = arith.constant 0 : i32
    %c0_i32_1 = arith.constant 0 : i32
    return %c0_i32, %c0_i32_0 : i32, i32
  }
  func.func @transform_8(%arg0: i32) -> (i32, i32) {
    %c0_i32 = arith.constant 0 : i32
    %c0_i32_0 = arith.constant 0 : i32
    %c0_i32_1 = arith.constant 0 : i32
    return %c0_i32, %c0_i32_0 : i32, i32
  }
  func.func @transform_9(%arg0: i32) -> (i32, i32) {
    %c0_i32 = arith.constant 0 : i32
    %c0_i32_0 = arith.constant 0 : i32
    return %arg0, %c0_i32 : i32, i32
  }
}

</mosaic_0001>

<bundles_post_ra>
// kernel: tpu_custom_call.1
= control target key start
LH: loop header
LB: loop body
LE: loop exit
PB: predicated region body
PF: predicated region fallthrough
CT: control target
= control target key end

     0   :  { %14 = vsyncpa [#allocation3], 0  ;;  %s877_s0 = inlined_call_operand.vmem [shape: bf16[16,32], index: 0, kind: input, shape index: {}]   ;;  %s878_s1 = inlined_call_operand.vmem [shape: bf16[32,256], index: 1, kind: input, shape index: {}]   ;;  %s879_s2 = inlined_call_operand.vmem [shape: f32[1,256], index: 2, kind: input, shape index: {}]   ;;  %s880_s3 = inlined_call_operand.hbm [shape: bf16[256,128], index: 3, kind: input, shape index: {}]   ;;  %s881_s4 = inlined_call_operand.vmem [shape: f32[1,128], index: 4, kind: input, shape index: {}]   ;;  %s882_s5 = inlined_call_operand.vmem [shape: bf16[128,64], index: 5, kind: input, shape index: {}]   ;;  %s883_s6 = inlined_call_operand.vmem [shape: f32[1,64], index: 6, kind: input, shape index: {}]   ;;  %s884_s7 = inlined_call_operand.vmem [shape: bf16[64,128], index: 7, kind: input, shape index: {}]   ;;  %s885_s8 = inlined_call_operand.vmem [shape: f32[1,128], index: 8, kind: input, shape index: {}]   ;;  %s886_s9 = inlined_call_operand.hbm [shape: f32[16,128], index: 9, kind: output, shape index: {}]  }
   0x1   :  { %15 = vsyncpa [#allocation4], 0  ;;  %s735_s30 = smov [#allocation2]  }
   0x2   :  { %s27_s10 = sshll.u32 %s735_s30, 4  ;;  %s28_s10 = int_to_ptr.vmem [resolvable:$true] %s27_s10 }
   0x3   :  { %s699_s11 = scalar_lea.vmem %s28_s10, 2048  ;;  %p704_p1 = scmp.lt.s32.totalorder %s28_s10, %s28_s10 }
   0x4   :  { %p700_p0 = scmp.ne.s32.totalorder %s28_s10, %s699_s11  ;;  %p705_p2 = scmp.lt.s32.totalorder %s699_s11, %s699_s11 }
   0x6   :  { %p706_p3 = por %p705_p2, %p704_p1 }
   0x8   :  { %p707_p4 = pnand %p706_p3, %p700_p0 }
   0xa   :  { %710 = shalt.err (!%p707_p4)
}
   0xb   :  { %s736_s12 = smov 64   ;;  %s737_s13 = smov 4  }
   0xc   :  { %33 = dma.hbm_to_vmem [thread:$0]  %s880_s3, 2048, %s28_s10, [#allocation3], %s736_s12, %s736_s12, %s737_s13  }
   0xd   :  { %731 = dma.done.wait [#allocation3], 2048  }
   0xe   :  { %732 = vsyncadd [#allocation3], 4294965248  ;;  %v738_v0 = vmov 0   ;;  %v656_v1 = vld [vmem:[%s878_s1 + $0x14] ss:$8 sps:$4 sm:$0xff]   ;;  %v662_v5 = vld [vmem:[%s877_s0] sm:$0xff]   ;;  %v56_v27 = vlaneseq }
   0xf   :  { %127 = vmatprep.mubr.bf16.mxu0 %v738_v0  ;;  %v658_v2 = vld [vmem:[%s878_s1 + $0x10] ss:$8 sps:$4 sm:$0xff]   ;;  %107 = vmatprep.subr.bf16.mxu0 %v656_v1  ;;  %v659_v3 = vld [vmem:[%s878_s1 + $0x4] ss:$8 sps:$4 sm:$0xff]   ;;  %v661_v4 = vld [vmem:[%s878_s1] ss:$8 sps:$4 sm:$0xff]  }
  0x10   :  { %108 = vmatpush1.bf16.msra.mxu0 %v658_v2  ;;  %v663_v6 = vld [vmem:[#allocation2 + $0x78] sm:$0xff]   ;;  %v665_v8 = vld [vmem:[#allocation2 + $0x70] sm:$0xff]   ;;  %vm91_vm0 = vcmask 261120   ;;  %v667_v10 = vld [vmem:[#allocation2 + $0x68] sm:$0xff]   ;;  %v739_v23 = vmov 0.0   ;;  %v57_v28 = vshrl.u32 %v56_v27, 7 }
  0x11   :  { %109 = vmatprep.subr.bf16.mxu0 %v659_v3  ;;  %v664_v7 = vld [vmem:[#allocation2 + $0x38] sm:$0xff]   ;;  %579 = vmatprep.subr.bf16.mxu1 %v663_v6  ;;  %v666_v9 = vld [vmem:[#allocation2 + $0x30] sm:$0xff]   ;;  %v668_v11 = vld [vmem:[#allocation2 + $0x28] sm:$0xff]   ;;  %vm740_vm1 = vmmov 0   ;;  %vm477_vm2 = vcmask 523264  }
  0x12   :  { %580 = vmatpush3.bf16.msra.mxu1 %v664_v7  ;;  %v669_v12 = vld [vmem:[#allocation2 + $0x60] sm:$0xff]   ;;  %v671_v14 = vld [vmem:[#allocation2 + $0x58] sm:$0xff]   ;;  %v673_v16 = vld [vmem:[#allocation2 + $0x50] sm:$0xff]   ;;  %v62_v29 = vsub.s32 1, %v57_v28  ;;  %v58_v30 = vsub.s32 0, %v57_v28 }
  0x13   :  { %581 = vmatprep.subr.bf16.mxu1 %v665_v8  ;;  %v670_v13 = vld [vmem:[#allocation2 + $0x20] sm:$0xff]   ;;  %v672_v15 = vld [vmem:[#allocation2 + $0x18] sm:$0xff]   ;;  %v674_v17 = vld [vmem:[#allocation2 + $0x10] sm:$0xff]  }
  0x14   :  { %110 = vmatpush1.bf16.msra.mxu0 %v661_v4  ;;  %v675_v18 = vld [vmem:[#allocation2 + $0x48] sm:$0xff]   ;;  %v677_v20 = vld [vmem:[#allocation2 + $0x40] sm:$0xff]   ;;  %v679_v22 = vld [vmem:[%s882_s5 + $0x38] sm:$0xff]  }
  0x15   :  { %v676_v19 = vld [vmem:[#allocation2 + $0x8] sm:$0xff]   ;;  %v678_v21 = vld [vmem:[#allocation2] sm:$0xff]   ;;  %615 = vmatprep.subr.bf16.mxu0 %v739_v23  ;;  %v680_v24 = vld [vmem:[%s882_s5 + $0x30] sm:$0xff]  }
  0x16   :  { %582 = vmatpush3.bf16.msra.mxu1 %v666_v9  ;;  %v681_v25 = vld [vmem:[%s882_s5 + $0x28] sm:$0xff]   ;;  %v682_v26 = vld [vmem:[%s882_s5 + $0x20] sm:$0xff]   ;;  %v683_v48 = vld [vmem:[%s882_s5 + $0x18] sm:$0xff]  }
  0x17   :  { %546 = vmatmul.mubr.msk.bf16.vlgmr.msra.gmra.mxu0 %vm91_vm0, %v662_v5  ;;  %583 = vmatprep.subr.bf16.mxu1 %v667_v10  ;;  %v54_v31 = vld [vmem:[%s879_s2] sm:$0x3]  ;;  %v684_v49 = vld [vmem:[%s882_s5 + $0x10] sm:$0xff]   ;;  %v685_v50 = vld [vmem:[%s882_s5 + $0x8] sm:$0xff]  }
  0x18   :  { %616 = vmatpush3.bf16.msra.mxu0 %v679_v22  ;;  %v63_v33 = vrot.slane %v54_v31, %v62_v29  ;;  %v59_v34 = vrot.slane %v54_v31, %v58_v30  ;;  %v686_v51 = vld [vmem:[%s882_s5] sm:$0xff]   ;;  %631 = vmatprep.mubr.msk.bf16.mxu0 %vm740_vm1, %v739_v23  ;;  %v687_v52 = vld [vmem:[%s884_s7 + $0x18] sm:$0xff]   ;;  %v688_v1 = vld [vmem:[%s884_s7 + $0x10] sm:$0xff]  }
  0x19   :  { %617 = vmatprep.subr.bf16.mxu0 %v739_v23  ;;  %v547_v56 = vld [vmem:[%s881_s4] ss:$0 sm:$0xff]  ;;  %v689_v2 = vld [vmem:[%s884_s7 + $0x8] sm:$0xff]  }
  0x1a   :  { %584 = vmatpush3.bf16.msra.mxu1 %v668_v11  ;;  %v690_v3 = vld [vmem:[%s884_s7] sm:$0xff]   ;;  %s741_s7 = smov [#allocation5]  }
  0x1b   :  { %585 = vmatprep.subr.bf16.mxu1 %v669_v12  ;;  %v564_v4 = vld [vmem:[%s883_s6] ss:$0 sm:$0xff]  ;;  %s529_s28 = sshll.u32 %s741_s7, 4  ;;  %s530_s28 = int_to_ptr.vmem [resolvable:$true] %s529_s28 }
  0x1c   :  { %618 = vmatpush3.bf16.msra.mxu0 %v680_v24  ;;  %s711_s6 = scalar_lea.vmem %s530_s28, 256  ;;  %p716_p6 = scmp.lt.s32.totalorder %s530_s28, %s530_s28 }
  0x1d   :  { %619 = vmatprep.subr.bf16.mxu0 %v739_v23  ;;  %p712_p5 = scmp.ne.s32.totalorder %s530_s28, %s711_s6  ;;  %p717_p7 = scmp.lt.s32.totalorder %s711_s6, %s711_s6 }
  0x1e   :  { %586 = vmatpush3.bf16.msra.mxu1 %v670_v13 }
  0x1f   :  { %587 = vmatprep.subr.bf16.mxu1 %v671_v14  ;;  %v573_v14 = vld [vmem:[%s885_s8] ss:$0 sm:$0xff]  ;;  %p718_p8 = por %p717_p7, %p716_p6 }
  0x20   :  { %620 = vmatpush3.bf16.msra.mxu0 %v681_v25 }
  0x21   :  { %621 = vmatprep.subr.bf16.mxu0 %v739_v23  ;;  %p719_p9 = pnand %p718_p8, %p712_p5 }
  0x22   :  { %588 = vmatpush3.bf16.msra.mxu1 %v672_v15 }
  0x23   :  { %589 = vmatprep.subr.bf16.mxu1 %v673_v16 }
  0x24   :  { %622 = vmatpush3.bf16.msra.mxu0 %v682_v26 }
  0x25   :  { %623 = vmatprep.subr.bf16.mxu0 %v739_v23 }
  0x26   :  { %590 = vmatpush3.bf16.msra.mxu1 %v674_v17 }
  0x27   :  { %591 = vmatprep.subr.bf16.mxu1 %v675_v18 }
  0x28   :  { %624 = vmatpush3.bf16.msra.mxu0 %v683_v48 }
  0x29   :  { %625 = vmatprep.subr.bf16.mxu0 %v739_v23 }
  0x2a   :  { %592 = vmatpush3.bf16.msra.mxu1 %v676_v19 }
  0x2b   :  { %593 = vmatprep.subr.bf16.mxu1 %v677_v20 }
  0x2c   :  { %626 = vmatpush3.bf16.msra.mxu0 %v684_v49 }
  0x2d   :  { %627 = vmatprep.subr.bf16.mxu0 %v739_v23 }
  0x2e   :  { %594 = vmatpush3.bf16.msra.mxu1 %v678_v21 }
  0x2f   :  { %635 = vmatprep.subr.bf16.mxu1 %v739_v23 }
  0x30   :  { %628 = vmatpush3.bf16.msra.mxu0 %v685_v50 }
  0x31   :  { %629 = vmatprep.subr.bf16.mxu0 %v739_v23 }
  0x34   :  { %630 = vmatpush3.bf16.msra.mxu0 %v686_v51 }
  0xd7   :  { %v129_v32 = vpop.f32.mrf.mxu0 }
  0xd8   :  { %v130_v39 = vadd.f32 %v129_v32, %v59_v34 }
  0xd9   :  { %v131_v35 = vpop.f32.mrf.mxu0 }
  0xda   :  { %v132_v37 = vadd.f32 %v131_v35, %v63_v33  ;;  %v138_v45 = vmax.f32 %v130_v39, 0.0 }
  0xdb   :  { %v133_v36 = vpop.f32.mrf.mxu0 }
  0xdc   :  { %v134_v38 = vadd.f32 %v133_v36, %v59_v34  ;;  %v139_v43 = vmax.f32 %v132_v37, 0.0 }
  0xdd   :  { %v135_v40 = vpop.f32.mrf.mxu0 }
  0xde   :  { %v136_v41 = vadd.f32 %v135_v40, %v63_v33  ;;  %v140_v42 = vmax.f32 %v134_v38, 0.0 }
  0xe0   :  { %v141_v44 = vmax.f32 %v136_v41, 0.0  ;;  %v142_v47 = vpack.c.bf16 %v140_v42, %v138_v45 }
  0xe2   :  { %v143_v46 = vpack.c.bf16 %v141_v44, %v139_v43 }
  0xe4   :  { %311 = vmatprep.mubr.bf16.mxu1 %v143_v46 }
  0xe5   :  { %312 = vmatmul.mubr.bf16.vlgmr.msra.gmra.mxu1 %v142_v47 }
  0xe6   :  { %643 = vmatprep.mubr.msk.bf16.mxu1 %vm740_vm1, %v739_v23  ;;  %636 = vmatpush3.bf16.msra.mxu1 %v687_v52 }
  0xe7   :  { %637 = vmatprep.subr.bf16.mxu1 %v739_v23 }
  0xea   :  { %638 = vmatpush3.bf16.msra.mxu1 %v688_v1 }
  0xeb   :  { %639 = vmatprep.subr.bf16.mxu1 %v739_v23 }
  0xee   :  { %640 = vmatpush3.bf16.msra.mxu1 %v689_v2 }
  0xef   :  { %641 = vmatprep.subr.bf16.mxu1 %v739_v23 }
  0xf2   :  { %642 = vmatpush3.bf16.msra.mxu1 %v690_v3 }
 0x1a5   :  { %v595_v53 = vpop.f32.mrf.mxu1 }
 0x1a7   :  { %v596_v54 = vpop.f32.mrf.mxu1 }
 0x1a8   :  { %v597_v55 = vadd.f32 %v596_v54, %v595_v53 }
 0x1a9   :  { %v598_v57 = vpop.f32.mrf.mxu1 }
 0x1aa   :  { %v314_v59 = vadd.f32 %v597_v55, %v547_v56 }
 0x1ab   :  { %v599_v58 = vpop.f32.mrf.mxu1 }
 0x1ac   :  { %v600_v60 = vadd.f32 %v599_v58, %v598_v57  ;;  %v320_v62 = vmax.f32 %v314_v59, 0.0 }
 0x1ae   :  { %v317_v61 = vadd.f32 %v600_v60, %v547_v56 }
 0x1b0   :  { %v321_v63 = vmax.f32 %v317_v61, 0.0 }
 0x1b2   :  { %v322_v0 = vpack.c.bf16 %v321_v63, %v320_v62 }
 0x1b4   :  { %632 = vmatmul.mubr.bf16.vlgmr.msra.gmra.mxu0 %v322_v0 }
 0x274   :  { %v428_v5 = vpop.f32.mrf.mxu0 }
 0x275   :  { %v429_v7 = vadd.f32 %v564_v4, %v428_v5 }
 0x276   :  { %v633_v6 = vpop.f32.mrf.mxu0 }
 0x277   :  { %v435_v11 = vmax.f32 %v429_v7, 0.0 }
 0x278   :  { %v431_v8 = vpop.f32.mrf.mxu0 }
 0x279   :  { %v432_v9 = vadd.f32 %v564_v4, %v431_v8 }
 0x27a   :  { %v634_v10 = vpop.f32.mrf.mxu0 }
 0x27b   :  { %v436_v12 = vmax.f32 %v432_v9, 0.0 }
 0x27d   :  { %v437_v13 = vpack.c.bf16 %v436_v12, %v435_v11 }
 0x27f   :  { %644 = vmatmul.mubr.msk.bf16.vlgmr.msra.gmra.mxu1 %vm477_vm2, %v437_v13 }
 0x33f   :  { %v515_v15 = vpop.f32.mrf.mxu1 }
 0x340   :  { %v516_v16 = vadd.f32 %v573_v14, %v515_v15 }
 0x341   :  { %v645_v17 = vpop.f32.mrf.mxu1 }
 0x342   :  { %522 = vst [vmem:[#allocation5] sm:$0xff] %v516_v16 }
 0x343   :  { %v518_v18 = vpop.f32.mrf.mxu1 }
 0x344   :  { %v519_v19 = vadd.f32 %v573_v14, %v518_v18 }
 0x345   :  { %v646_v20 = vpop.f32.mrf.mxu1 }
 0x346   :  { %523 = vst [vmem:[#allocation5 + $0x8] sm:$0xff] %v519_v19 }
 0x347   :  { %722 = shalt.err (!%p719_p9)
}
 0x348   :  { %s742_s29 = smov 128   ;;  %s743_s8 = smov 8  }
 0x349   :  { %535 = dma.vmem_to_hbm [thread:$0]  %s530_s28, 256, %s886_s9, [#allocation4], %s742_s29, %s742_s29, %s743_s8  }
 0x34a   :  { %733 = dma.done.wait [#allocation4], 256  }
 0x34b   :  { %734 = vsyncadd [#allocation4], 4294967040 }
 0x34c   :  { %539 = vsyncpa [#allocation3], 1 }
 0x34d   :  { %540 = vsyncpa [#allocation4], 1 }

</bundles_post_ra>
